<compile_context>
chip_gen: v5e
topology: v5e:2x2
jax: 0.10.0
libtpu: 0.0.40
codegen_flags: <defaults>
</compile_context>

<pallas_src>
import functools

import jax
import jax.numpy as jnp
from jax.experimental import pallas as pl
from jax.experimental.pallas import tpu as pltpu


_LANE = 128
_SUBLANE = 8
_SMALL_INPUT_ELEMS = 1 << 17       # below this, plain XLA wins (launch overhead)
_MIN_SPLIT_BYTES = 4 * 1024 * 1024  # force >= 2 grid steps above this much traffic


def _round_up(x, m):
    return (x + m - 1) // m * m


def _cdiv(a, b):
    return -(-a // b)


def _vmem_budgets():
    """(tile working-set budget, scoped vmem_limit_bytes), per TPU generation."""
    cap = None
    try:
        cap = getattr(pltpu.get_tpu_info(), "vmem_capacity_bytes", None)
    except Exception:
        cap = None
    if cap is not None and cap >= 100 * 1024 * 1024:
        # v5e / v6e: 128 MiB physical VMEM -> use big tiles.
        return 56 * 1024 * 1024, 96 * 1024 * 1024
    # v7x (64 MiB physical) or unknown: stay comfortably under the ceiling.
    return 36 * 1024 * 1024, 52 * 1024 * 1024


def _choose_block_rows(num_rows, lane_dim, itemsize, tile_budget):
    """Byte-based block-height choice: 3 double-buffered input streams, the
    in-kernel f32 upcasts/temporaries, and the (small) f32 output tile."""
    bytes_per_row = (3 * 2 * lane_dim * itemsize   # a/p/n tiles, x2 pipeline buffers
                     + 5 * lane_dim * 4            # f32 upcasts + elementwise temps
                     + 2 * _LANE * 4)              # output tile (lane-padded), x2
    tb = max(_SUBLANE, tile_budget // bytes_per_row)
    tb = (tb // _SUBLANE) * _SUBLANE
    if tb < num_rows:
        return tb
    # Whole problem fits in one block.  Keep >= 2 grid steps when there is
    # enough data to matter so both v7x TensorCores (parallel grid axis) run.
    if num_rows >= 2 * _SUBLANE and 3 * num_rows * lane_dim * itemsize >= _MIN_SPLIT_BYTES:
        return min(num_rows, _round_up(_cdiv(num_rows, 2), _SUBLANE))
    return num_rows


def _triplet_rows_kernel(a_ref, p_ref, n_ref, loss_ref, *, margin):
    """Standard layout: one logical row per VMEM row.  Block (TB, D)."""
    a = a_ref[...].astype(jnp.float32)
    p = p_ref[...].astype(jnp.float32)
    n = n_ref[...].astype(jnp.float32)
    # dist_pos - dist_neg == sum((p - n) * (p + n - 2a), axis=1):
    # one reduction, half the f32 temporaries of the two-distance form.
    t = (p - n) * (p + n - 2.0 * a)
    diff = jnp.sum(t, axis=1, keepdims=True)                      # (TB, 1)
    loss_ref[...] = jnp.maximum(diff + jnp.float32(margin), 0.0)


def _triplet_packed_kernel(a_ref, p_ref, n_ref, loss_ref, *, margin, d, g):
    """Lane-dense layout: g = 128 // d logical rows per VMEM row.
    Blocks are (TR, 128); output block is (TR, g) per-logical-row losses."""
    a = a_ref[...].astype(jnp.float32)                            # (TR, 128)
    p = p_ref[...].astype(jnp.float32)
    n = n_ref[...].astype(jnp.float32)
    t = (p - n) * (p + n - 2.0 * a)                               # per-element contrib
    # Segmented sum of groups of `d` lanes via a constant 0/1 matrix on the
    # (otherwise idle) MXU: (TR, 128) @ (128, g) -> (TR, g).
    lane = jax.lax.broadcasted_iota(jnp.int32, (_LANE, g), 0)
    col = jax.lax.broadcasted_iota(jnp.int32, (_LANE, g), 1)
    seg_mat = (lane // d == col).astype(jnp.float32)
    diff = jnp.dot(t, seg_mat, preferred_element_type=jnp.float32)
    loss_ref[...] = jnp.maximum(diff + jnp.float32(margin), 0.0)


def triplet_loss_ref(anchor, positive, negative, margin=0.1, size_average=True):
    a = anchor.astype(jnp.float32)
    p = positive.astype(jnp.float32)
    n = negative.astype(jnp.float32)
    dp = jnp.sum((a - p) ** 2, axis=1)
    dn = jnp.sum((a - n) ** 2, axis=1)
    losses = jax.nn.relu(dp - dn + jnp.float32(margin))
    return jnp.mean(losses) if size_average else jnp.sum(losses)


def triplet_loss(anchor, positive, negative, margin=0.1, size_average=True,
                 block_rows=None, use_pallas=None):
    """TripletLoss forward. Returns a scalar float32.

    use_pallas: None -> auto (bypass the kernel for tiny inputs), True/False to force.
    block_rows: optional override of the kernel block height (in kernel rows).
    """
    assert anchor.shape == positive.shape == negative.shape
    assert anchor.ndim == 2
    B, D = anchor.shape

    if use_pallas is None:
        use_pallas = (B * D) >= _SMALL_INPUT_ELEMS
    if not use_pallas:
        # Tiny input: one fused XLA kernel beats a Pallas launch + extra dispatch.
        return triplet_loss_ref(anchor, positive, negative, margin, size_average)

    itemsize = jnp.dtype(anchor.dtype).itemsize
    tile_budget, vmem_limit = _vmem_budgets()

    # Lane-dense packing: view (B, D) as (B*D/128, 128) when it is an exact view.
    packed = (D < _LANE and _LANE % D == 0 and (B * D) % _LANE == 0
              and (B * D) // _LANE >= _SUBLANE)

    if packed:
        g = _LANE // D
        num_rows = (B * D) // _LANE
        width = _LANE
        out_cols = g
        inputs = tuple(x.reshape(num_rows, _LANE)
                       for x in (anchor, positive, negative))
        # NOTE: margin is a trace-time constant (distinct margin -> recompile).
        # TODO(synk): pass margin via an SMEM scalar if it varies at runtime.
        kernel = functools.partial(_triplet_packed_kernel,
                                   margin=float(margin), d=D, g=g)
    else:
        num_rows = B
        width = D
        out_cols = 1
        inputs = (anchor, positive, negative)
        kernel = functools.partial(_triplet_rows_kernel, margin=float(margin))

    lane_dim = _round_up(width, _LANE)
    if block_rows is not None:
        tb = min(int(block_rows), num_rows)
        if tb < num_rows:
            tb = max(_SUBLANE, (tb // _SUBLANE) * _SUBLANE)
    else:
        tb = _choose_block_rows(num_rows, lane_dim, itemsize, tile_budget)
    tb = min(tb, num_rows)

    num_blocks = _cdiv(num_rows, tb)
    rows_pad = num_blocks * tb

    spec_in = pl.BlockSpec((tb, width), lambda i: (i, 0))
    spec_out = pl.BlockSpec((tb, out_cols), lambda i: (i, 0))

    losses = pl.pallas_call(
        kernel,
        out_shape=jax.ShapeDtypeStruct((rows_pad, out_cols), jnp.float32),
        grid=(num_blocks,),
        in_specs=[spec_in, spec_in, spec_in],
        out_specs=spec_out,
        compiler_params=pltpu.CompilerParams(
            dimension_semantics=("parallel",),
            vmem_limit_bytes=vmem_limit,
        ),
    )(*inputs)

    # Rows >= num_rows came from the grid-padded last block (unspecified input
    # data) — slice them away before the tiny XLA-side reduction.
    total = jnp.sum(losses[:num_rows])
    if size_average:
        total = total / jnp.float32(B)
    return total


if __name__ == "__main__":
    key = jax.random.PRNGKey(0)
    k_a, k_p, k_n = jax.random.split(key, 3)

    def rand(k, shape, dtype=jnp.float32):
        return jax.random.normal(k, shape, dtype=jnp.float32).astype(dtype)

    # 1) Module-default-sized input (batch=8, dim=32), forcing the Pallas path
    #    (standard row kernel: packed view needs >= 8 packed rows).
    B, D = 8, 32
    a = rand(k_a, (B, D)); p = rand(k_p, (B, D)); n = rand(k_n, (B, D))
    out = jax.block_until_ready(triplet_loss(a, p, n, 0.1, True, use_pallas=True))
    ref = triplet_loss_ref(a, p, n, 0.1, True)
    assert jnp.allclose(out, ref, rtol=1e-4, atol=1e-4), (out, ref)

    out_s = jax.block_until_ready(triplet_loss(a, p, n, 0.1, False, use_pallas=True))
    ref_s = triplet_loss_ref(a, p, n, 0.1, False)
    assert jnp.allclose(out_s, ref_s, rtol=1e-4, atol=1e-4), (out_s, ref_s)

    # 2) Lane-dense packed path, single block: B*D/128 = 8 packed rows.
    B2 = 32
    a2 = rand(k_a, (B2, D)); p2 = rand(k_p, (B2, D)); n2 = rand(k_n, (B2, D))
    out2 = jax.block_until_ready(triplet_loss(a2, p2, n2, 0.1, True, use_pallas=True))
    ref2 = triplet_loss_ref(a2, p2, n2, 0.1, True)
    assert jnp.allclose(out2, ref2, rtol=1e-4, atol=1e-4), (out2, ref2)

    # 3) Packed path with a multi-step grid and a partial last block
    #    (10 packed rows, block_rows=8 -> 2 grid steps on the "parallel" axis).
    B3 = 40
    a3 = rand(k_a, (B3, D)); p3 = rand(k_p, (B3, D)); n3 = rand(k_n, (B3, D))
    out3 = jax.block_until_ready(
        triplet_loss(a3, p3, n3, 0.2, True, block_rows=8, use_pallas=True))
    ref3 = triplet_loss_ref(a3, p3, n3, 0.2, True)
    assert jnp.allclose(out3, ref3, rtol=1e-4, atol=1e-4), (out3, ref3)

    # 4) Standard path with lane-padded D (96 does not divide 128), multi-block
    #    grid with a partial last block.
    B4, D4 = 20, 96
    a4 = rand(k_a, (B4, D4)); p4 = rand(k_p, (B4, D4)); n4 = rand(k_n, (B4, D4))
    out4 = jax.block_until_ready(
        triplet_loss(a4, p4, n4, 0.1, False, block_rows=8, use_pallas=True))
    ref4 = triplet_loss_ref(a4, p4, n4, 0.1, False)
    assert jnp.allclose(out4, ref4, rtol=1e-4, atol=1e-4), (out4, ref4)

    # 5) Narrow-dtype (bf16) streamed as-is, upcast to f32 in-kernel (packed path).
    a5 = a3.astype(jnp.bfloat16); p5 = p3.astype(jnp.bfloat16); n5 = n3.astype(jnp.bfloat16)
    out5 = jax.block_until_ready(
        triplet_loss(a5, p5, n5, 0.1, False, block_rows=8, use_pallas=True))
    ref5 = triplet_loss_ref(a5, p5, n5, 0.1, False)
    assert jnp.allclose(out5, ref5, rtol=2e-3, atol=2e-3), (out5, ref5)

    # 6) Auto mode on a tiny input takes the fused pure-JAX bypass.
    out6 = jax.block_until_ready(triplet_loss(a, p, n, 0.1, True))
    assert jnp.allclose(out6, ref, rtol=1e-6, atol=1e-6), (out6, ref)

    print("KERNEL_OK")
</pallas_src>

<mosaic_0001>
module attributes {stable_mosaic.version = 11 : i64} {
  func.func @_triplet_rows_kernel(%arg0: i32, %arg1: memref<8x32xf32, #tpu.memory_space<vmem>>, %arg2: memref<8x32xf32, #tpu.memory_space<vmem>>, %arg3: memref<8x32xf32, #tpu.memory_space<vmem>>, %arg4: memref<8x1xf32, #tpu.memory_space<vmem>>) attributes {dimension_semantics = [#tpu.dimension_semantics<parallel>], iteration_bounds = array<i64: 1>, scalar_prefetch = 0 : i64, scratch_operands = 0 : i64, tpu.core_type = #tpu.core_type<tc>, window_params = [{transform_indices = @transform_0, window_bounds = array<i64: 8, 32>}, {transform_indices = @transform_1, window_bounds = array<i64: 8, 32>}, {transform_indices = @transform_2, window_bounds = array<i64: 8, 32>}, {transform_indices = @transform_3, window_bounds = array<i64: 8, 1>}]} {
    %c0 = arith.constant 0 : index
    %c0_0 = arith.constant 0 : index
    %0 = vector.load %arg1[%c0, %c0_0] : memref<8x32xf32, #tpu.memory_space<vmem>>, vector<8x32xf32>
    %c0_1 = arith.constant 0 : index
    %c0_2 = arith.constant 0 : index
    %1 = vector.load %arg2[%c0_1, %c0_2] : memref<8x32xf32, #tpu.memory_space<vmem>>, vector<8x32xf32>
    %c0_3 = arith.constant 0 : index
    %c0_4 = arith.constant 0 : index
    %2 = vector.load %arg3[%c0_3, %c0_4] : memref<8x32xf32, #tpu.memory_space<vmem>>, vector<8x32xf32>
    %3 = arith.subf %1, %2 : vector<8x32xf32>
    %4 = arith.addf %1, %2 : vector<8x32xf32>
    %cst = arith.constant 2.000000e+00 : f32
    %5 = vector.broadcast %cst : f32 to vector<8x32xf32>
    %6 = arith.mulf %5, %0 : vector<8x32xf32>
    %7 = arith.subf %4, %6 : vector<8x32xf32>
    %8 = arith.mulf %3, %7 : vector<8x32xf32>
    %cst_5 = arith.constant dense<0.000000e+00> : vector<8xf32>
    %9 = vector.multi_reduction <add>, %8, %cst_5 [1] : vector<8x32xf32> to vector<8xf32>
    %10 = vector.shape_cast %9 : vector<8xf32> to vector<8x1xf32>
    %cst_6 = arith.constant 1.000000e-01 : f32
    %11 = vector.broadcast %cst_6 : f32 to vector<8x1xf32>
    %12 = arith.addf %10, %11 : vector<8x1xf32>
    %cst_7 = arith.constant 0.000000e+00 : f32
    %13 = vector.broadcast %cst_7 : f32 to vector<8x1xf32>
    %14 = arith.maximumf %12, %13 : vector<8x1xf32>
    %c0_8 = arith.constant 0 : index
    %c0_9 = arith.constant 0 : index
    %15 = vector.load %arg4[%c0_8, %c0_9] : memref<8x1xf32, #tpu.memory_space<vmem>>, vector<8x1xf32>
    tpu.vector_store %arg4[%c0_8, %c0_9], %14 {strides = array<i32>} : memref<8x1xf32, #tpu.memory_space<vmem>>, vector<8x1xf32>,
    return
  }
  func.func @transform_0(%arg0: i32) -> (i32, i32) {
    %c0_i32 = arith.constant 0 : i32
    %c0_i32_0 = arith.constant 0 : i32
    return %arg0, %c0_i32 : i32, i32
  }
  func.func @transform_1(%arg0: i32) -> (i32, i32) {
    %c0_i32 = arith.constant 0 : i32
    %c0_i32_0 = arith.constant 0 : i32
    return %arg0, %c0_i32 : i32, i32
  }
  func.func @transform_2(%arg0: i32) -> (i32, i32) {
    %c0_i32 = arith.constant 0 : i32
    %c0_i32_0 = arith.constant 0 : i32
    return %arg0, %c0_i32 : i32, i32
  }
  func.func @transform_3(%arg0: i32) -> (i32, i32) {
    %c0_i32 = arith.constant 0 : i32
    %c0_i32_0 = arith.constant 0 : i32
    return %arg0, %c0_i32 : i32, i32
  }
}

</mosaic_0001>

<bundles_post_ra>
// kernel: tpu_custom_call.1
= control target key start
LH: loop header
LB: loop body
LE: loop exit
PB: predicated region body
PF: predicated region fallthrough
CT: control target
= control target key end

     0   :  { %8 = vsyncpa [#allocation3], 0  ;;  %s191_s0 = inlined_call_operand.hbm [shape: f32[8,32], index: 0, kind: input, shape index: {}]   ;;  %s192_s1 = inlined_call_operand.hbm [shape: f32[8,32], index: 1, kind: input, shape index: {}]   ;;  %s193_s2 = inlined_call_operand.hbm [shape: f32[8,32], index: 2, kind: input, shape index: {}]   ;;  %s194_s3 = inlined_call_operand.vmem [shape: f32[8,1], index: 3, kind: output, shape index: {}]  }
   0x1   :  { %9 = vsyncpa [#allocation5], 0  ;;  %s26_s14 = sshll.u32 %s192_s1, 4  ;;  %s156_s15 = smov [#allocation4]   ;;  %s27_s14 = int_to_ptr.hbm [resolvable:$true] %s26_s14 }
   0x2   :  { %s28_s16 = sshll.u32 %s156_s15, 4  ;;  %s15_s19 = sshll.u32 %s191_s0, 4  ;;  %s29_s16 = int_to_ptr.vmem [resolvable:$true] %s28_s16  ;;  %s16_s19 = int_to_ptr.hbm [resolvable:$true] %s15_s19 }
   0x3   :  { %31 = dma.hbm_to_vmem [thread:$0]  %s27_s14, 128, %s29_s16, [#allocation5]  }
   0x4   :  { %s157_s20 = smov [#allocation2]   ;;  %s37_s24 = sshll.u32 %s193_s2, 4  ;;  %s38_s24 = int_to_ptr.hbm [resolvable:$true] %s37_s24 }
   0x5   :  { %s17_s21 = sshll.u32 %s157_s20, 4  ;;  %s158_s1 = smov [#allocation6]   ;;  %s18_s21 = int_to_ptr.vmem [resolvable:$true] %s17_s21 }
   0x6   :  { %20 = dma.hbm_to_vmem [thread:$0]  %s16_s19, 128, %s18_s21, [#allocation3]  }
   0x7   :  { %s39_s25 = sshll.u32 %s158_s1, 4  ;;  %s40_s25 = int_to_ptr.vmem [resolvable:$true] %s39_s25 }
   0x8   :  { %42 = dma.hbm_to_vmem [thread:$0]  %s38_s24, 128, %s40_s25, [#allocation5]  }
   0x9   :  { %152 = dma.done.wait [#allocation3], 128  }
   0xa   :  { %153 = vsyncadd [#allocation3], 4294967168 }
   0xb   :  { %154 = dma.done.wait [#allocation5], 256  }
   0xc   :  { %155 = vsyncadd [#allocation5], 4294967040  ;;  %v55_v0 = vld [vmem:[#allocation2] sm:$0xff]  ;;  %v56_v1 = vld [vmem:[#allocation4] sm:$0xff]  ;;  %vm63_vm0 = vcmask 261120   ;;  %vm69_vm1 = vcmask 7168  }
   0xd   :  { %v57_v2 = vld [vmem:[#allocation6] sm:$0xff]  ;;  %v60_v5 = vmul.f32 2.0, %v55_v0 }
   0xe   :  { %v58_v3 = vsub.f32 %v56_v1, %v57_v2  ;;  %v59_v4 = vadd.f32 %v57_v2, %v56_v1 }
  0x10   :  { %v61_v6 = vsub.f32 %v59_v4, %v60_v5 }
  0x12   :  { %v62_v7 = vmul.f32 %v61_v6, %v58_v3 }
  0x14   :  { %v64_v8 = vsel %vm63_vm0, %v62_v7, 0.0 }
  0x15   :  { %65 = vadd.xlane.f32.xlu0 %v64_v8 }
  0x88   :  { %v66_v9 = vpop.xlane.xlu0 %65 }
  0x89   :  { %v67_v10 = vadd.f32 0.1, %v66_v9 }
  0x8b   :  { %v68_v11 = vmax.f32 %v67_v10, 0.0 }
  0x8d   :  { %70 = vst.msk [vmem:[%s194_s3] sm:$0xff] %vm69_vm1, %v68_v11 }
  0x8e   :  { %75 = vsyncpa [#allocation3], 1 }
  0x8f   :  { %76 = vsyncpa [#allocation5], 1 }

</bundles_post_ra>
